<compile_context>
chip_gen: v7x
topology: tpu7x:2x2x1
jax: 0.10.0
libtpu: 0.0.40
codegen_flags: <defaults>
</compile_context>

<pallas_src>
import functools

import jax
import jax.numpy as jnp
import numpy as np
from jax.experimental import pallas as pl
from jax.experimental.pallas import tpu as pltpu

F32 = jnp.float32
BF16 = jnp.bfloat16
# MaxPool2d implicit padding value.  NEG_BIG (f32 min, not -inf) is safe here
# because the center tap of the 3x3 max window is always in-bounds, so NEG_BIG
# never survives the max and is never multiplied.
NEG_BIG = float(np.finfo(np.float32).min)


def _pad8(c):
    return ((c + 7) // 8) * 8


# ----------------------------------------------------------------------------
# pltpu.roll direction probe (runs once, tiny kernel) -> convention-proof rolls
# ----------------------------------------------------------------------------
@functools.lru_cache(maxsize=None)
def _roll_is_np_convention() -> bool:
    def k(x_ref, o_ref):
        o_ref[...] = pltpu.roll(x_ref[...], 1, axis=1)

    x = jnp.broadcast_to(jnp.arange(128, dtype=F32), (8, 128))
    out = pl.pallas_call(k, out_shape=jax.ShapeDtypeStruct((8, 128), F32))(x)
    # np.roll convention: out[i] = x[i - 1]  =>  out[0, 0] == 127.
    return bool(np.asarray(out)[0, 0] == 127.0)


# ----------------------------------------------------------------------------
# in-kernel helpers (values in (C, P) layout, P = N*H*W on the lane axis)
# ----------------------------------------------------------------------------
def _roll(x, s, np_conv):
    """out[:, p] = x[:, (p + s) % P]   (s static; circular, masked by caller)."""
    if s == 0:
        return x
    P = x.shape[-1]
    shift = (-s) % P if np_conv else s % P
    return pltpu.roll(x, shift, axis=1)


def _conv3x3(x, w, b, img_w, tm, np_conv):
    """3x3 conv, stride 1, zero pad 1, as ONE bf16 MXU matmul over K = 9*Cin.

    x:  (Cin_p, P) f32 activations
    w:  (Cout_p, 9*Cin_p) bf16 tap-major folded weights (BN scale pre-folded)
    b:  (Cout_p, 1) f32 folded BN bias
    tm: (9, P) f32 per-tap 0/1 validity masks (row/column/image edges)
    """
    taps = []
    t = 0
    for dy in (-1, 0, 1):
        for dx in (-1, 0, 1):
            v = _roll(x, dy * img_w + dx, np_conv)
            if not (dy == 0 and dx == 0):
                v = v * tm[t:t + 1]          # mask in f32, then cast for MXU
            taps.append(v.astype(BF16))
            t += 1
    patches = jnp.concatenate(taps, axis=0)                   # (9*Cin_p, P) bf16
    out = jnp.dot(w, patches, preferred_element_type=F32)     # f32 accumulate
    return out + b


def _maxpool3x3(x, img_w, tm, np_conv):
    """3x3 max pool, pad 1, stride 1, separable (horizontal then vertical max)."""
    left = jnp.where(tm[3:4] > 0.5, _roll(x, -1, np_conv), NEG_BIG)
    right = jnp.where(tm[5:6] > 0.5, _roll(x, +1, np_conv), NEG_BIG)
    h = jnp.maximum(x, jnp.maximum(left, right))
    up = jnp.where(tm[1:2] > 0.5, _roll(h, -img_w, np_conv), NEG_BIG)
    down = jnp.where(tm[7:8] > 0.5, _roll(h, +img_w, np_conv), NEG_BIG)
    return jnp.maximum(h, jnp.maximum(up, down))


# ----------------------------------------------------------------------------
# fused Pallas kernel: the whole enc (all 4 blocks), batch folded into lanes
# ----------------------------------------------------------------------------
def _enc_kernel(*refs, img_w0, img_w1, cout, roll_np):
    x_ref, sel_ref, tm0_ref, tm1_ref = refs[:4]
    o_ref = refs[-1]
    wb = refs[4:-1]                 # 8 refs per block: wm, bm, w1, b1, w2, b2, w3, b3
    n_blocks = len(wb) // 8

    x = x_ref[...]                  # (Cin_p, P0) f32
    sel = sel_ref[...]              # (P0, P1)  bf16 0/1 stride-2 subsampler
    tm0 = tm0_ref[...]              # (9, P0)   f32 per-tap masks, full res
    tm1 = tm1_ref[...]              # (9, P1)   half res

    # ---- block 0: downsampling (stride 2 via one shared selection matmul) ----
    wm, bm, w1, b1, w2, b2, w3, b3 = (r[...] for r in wb[:8])
    m_full = _conv3x3(x, wm, bm, img_w0, tm0, roll_np)                  # main branch
    e = _conv3x3(jnp.maximum(x, 0.0), w1, b1, img_w0, tm0, roll_np)     # ReLU + dsc1
    e = _conv3x3(jnp.maximum(e, 0.0), w2, b2, img_w0, tm0, roll_np)     # ReLU + dsc2
    e = _conv3x3(jnp.maximum(e, 0.0), w3, b3, img_w0, tm0, roll_np)     # ReLU + dsc3
    pooled = _maxpool3x3(e, img_w0, tm0, roll_np)
    both = jnp.concatenate([m_full.astype(BF16), pooled.astype(BF16)], axis=0)
    both = jnp.dot(both, sel, preferred_element_type=F32)               # (2*cout, P1)
    m = both[:cout]
    e = both[cout:] + m

    # ---- blocks 1..n-1: stride 1 at half resolution ----
    for blk in range(1, n_blocks):
        wm, bm, w1, b1, w2, b2, w3, b3 = (r[...] for r in wb[8 * blk: 8 * blk + 8])
        m_new = _conv3x3(m, wm, bm, img_w1, tm1, roll_np)
        t = _conv3x3(jnp.maximum(e, 0.0), w1, b1, img_w1, tm1, roll_np)
        t = _conv3x3(jnp.maximum(t, 0.0), w2, b2, img_w1, tm1, roll_np)
        t = _conv3x3(jnp.maximum(t, 0.0), w3, b3, img_w1, tm1, roll_np)
        e = _maxpool3x3(t, img_w1, tm1, roll_np) + m_new
        m = m_new

    o_ref[...] = e                  # (cout, P1) lane-dense store


# ----------------------------------------------------------------------------
# trace-time weight folding / layout prep (tiny XLA ops, once per call)
# ----------------------------------------------------------------------------
def _prep_main_w(w9, scale, bias, cin_p):
    # w9: (9, Cin, Cout) -> bf16 (Cout, 9*cin_p), BN scale folded; bias (Cout, 1)
    cin, cout = w9.shape[1], w9.shape[2]
    w = w9 * scale[None, None, :]
    w = jnp.pad(w, ((0, 0), (0, cin_p - cin), (0, 0)))
    w = jnp.transpose(w, (2, 0, 1)).reshape(cout, 9 * cin_p)
    return w.astype(BF16), bias.reshape(cout, 1).astype(F32)


def _prep_dsc_w(dw, pw, scale, bias, cin_p, cout_p):
    # depthwise (9,Cin) x pointwise (Cin,Cout) x BN -> bf16 (Cout_p, 9*Cin_p)
    cin, cout = pw.shape
    wf = dw[:, :, None] * pw[None, :, :] * scale[None, None, :]      # (9, cin, cout)
    wf = jnp.pad(wf, ((0, 0), (0, cin_p - cin), (0, cout_p - cout)))
    wf = jnp.transpose(wf, (2, 0, 1)).reshape(cout_p, 9 * cin_p)
    b = jnp.pad(bias, (0, cout_p - cout)).reshape(cout_p, 1)
    return wf.astype(BF16), b.astype(F32)


def _tap_masks(n, h, w):
    """(9, n*h*w) f32: 1 where the 3x3 tap (dy,dx) is in-bounds for its image."""
    P = n * h * w
    p = np.arange(P)
    x = p % w
    y = (p % (h * w)) // w
    masks = np.zeros((9, P), np.float32)
    t = 0
    for dy in (-1, 0, 1):
        for dx in (-1, 0, 1):
            ok = np.ones(P, bool)
            if dy == -1:
                ok &= y != 0
            if dy == 1:
                ok &= y != h - 1
            if dx == -1:
                ok &= x != 0
            if dx == 1:
                ok &= x != w - 1
            masks[t] = ok
            t += 1
    return jnp.asarray(masks)


def _make_sel(n, h, w, stride):
    """Block-diagonal 0/1 (n*h*w, n*ho*wo) matrix selecting the stride-2 grid."""
    ho, wo = (h - 1) // stride + 1, (w - 1) // stride + 1
    s = np.zeros((n * h * w, n * ho * wo), np.float32)
    for img in range(n):
        yo, xo = np.meshgrid(np.arange(ho), np.arange(wo), indexing="ij")
        src = img * h * w + (yo * stride) * w + xo * stride
        dst = img * ho * wo + yo * wo + xo
        s[src.reshape(-1), dst.reshape(-1)] = 1.0
    return jnp.asarray(s, BF16), ho, wo


# ----------------------------------------------------------------------------
# enc forward (single fused pallas_call), NCHW in -> NCHW out
# ----------------------------------------------------------------------------
def enc_forward(x_nchw, params):
    roll_np = _roll_is_np_convention()

    N, C, H, W = x_nchw.shape
    cin_p = _pad8(C)
    P0 = N * H * W
    x = jnp.transpose(x_nchw, (1, 0, 2, 3)).reshape(C, P0)
    x = jnp.pad(x, ((0, cin_p - C), (0, 0)))                      # (cin_p, P0)

    sel, Ho, Wo = _make_sel(N, H, W, 2)
    P1 = N * Ho * Wo
    tm0 = _tap_masks(N, H, W)
    tm1 = _tap_masks(N, Ho, Wo)

    weights = []
    cin = C
    for p in params:
        cpi = _pad8(cin)
        c0, c1, c2 = p["pw1"].shape[1], p["pw2"].shape[1], p["pw3"].shape[1]
        wm, bm = _prep_main_w(p["w_main"], p["s_main"], p["b_main"], cpi)
        w1, b1 = _prep_dsc_w(p["dw1"], p["pw1"], p["s1"], p["b1"], cpi, _pad8(c0))
        w2, b2 = _prep_dsc_w(p["dw2"], p["pw2"], p["s2"], p["b2"], _pad8(c0), _pad8(c1))
        w3, b3 = _prep_dsc_w(p["dw3"], p["pw3"], p["s3"], p["b3"], _pad8(c1), _pad8(c2))
        weights += [wm, bm, w1, b1, w2, b2, w3, b3]
        cin = c2
    cout = cin                                                     # 48 (multiple of 8)

    inputs = [x, sel, tm0, tm1] + weights
    in_specs = [pl.BlockSpec(a.shape, lambda i: (0, 0)) for a in inputs]

    kernel = functools.partial(_enc_kernel, img_w0=W, img_w1=Wo,
                               cout=cout, roll_np=roll_np)

    out = pl.pallas_call(
        kernel,
        out_shape=jax.ShapeDtypeStruct((cout, P1), F32),
        grid=(1,),
        in_specs=in_specs,
        out_specs=pl.BlockSpec((cout, P1), lambda i: (0, 0)),
        compiler_params=pltpu.CompilerParams(
            dimension_semantics=("arbitrary",)),
    )(*inputs)
    out = out.reshape(cout, N, Ho, Wo)
    return jnp.transpose(out, (1, 0, 2, 3))                       # (N, 48, Ho, Wo)


# ----------------------------------------------------------------------------
# pure-JAX reference (same math, no Pallas) for the correctness check — NHWC
# ----------------------------------------------------------------------------
def _extract_patches(x, stride, pad_value):
    N, H, W, C = x.shape
    Ho = (H - 1) // stride + 1
    Wo = (W - 1) // stride + 1
    xp = jnp.pad(x, ((0, 0), (1, 1), (1, 1), (0, 0)), constant_values=pad_value)
    taps = []
    for ky in range(3):
        for kx in range(3):
            sl = xp[:, ky:ky + stride * (Ho - 1) + 1:stride,
                    kx:kx + stride * (Wo - 1) + 1:stride, :]
            taps.append(sl)
    p = jnp.stack(taps, axis=1)
    return p.reshape(N, 9, Ho * Wo, C), Ho, Wo


def conv3x3_bn_ref(x, w, scale, bias, stride):
    p, Ho, Wo = _extract_patches(x, stride, 0.0)
    out = jnp.einsum("ntpc,tco->npo", p, w) * scale + bias
    return out.reshape(x.shape[0], Ho, Wo, w.shape[2])


def dsc_bn_ref(x, dw_w, pw_w, scale, bias, relu_input):
    p, Ho, Wo = _extract_patches(x, 1, 0.0)
    if relu_input:
        p = jnp.maximum(p, 0.0)
    dw = jnp.einsum("ntpc,tc->npc", p, dw_w)
    out = jnp.einsum("npc,co->npo", dw, pw_w) * scale + bias
    return out.reshape(x.shape[0], Ho, Wo, pw_w.shape[1])


def maxpool_add_ref(x, m, stride):
    p, Ho, Wo = _extract_patches(x, stride, NEG_BIG)
    mx = jnp.max(p, axis=1).reshape(x.shape[0], Ho, Wo, x.shape[3])
    return mx + m


def enc_forward_ref(x, params):
    m, e = x, x
    for i, p in enumerate(params):
        s = 2 if i == 0 else 1
        mm = conv3x3_bn_ref(m, p["w_main"], p["s_main"], p["b_main"], s)
        t = e
        t = dsc_bn_ref(t, p["dw1"], p["pw1"], p["s1"], p["b1"], True)
        t = dsc_bn_ref(t, p["dw2"], p["pw2"], p["s2"], p["b2"], True)
        t = dsc_bn_ref(t, p["dw3"], p["pw3"], p["s3"], p["b3"], True)
        e = maxpool_add_ref(t, mm, s)
        m = mm
    return e


# ----------------------------------------------------------------------------
# deterministic parameter initialization
# (BatchNorm2d folded as inference-mode scale/bias — no batch-stat updates)
# ----------------------------------------------------------------------------
def _make_bn(key, c):
    k1, k2, k3, k4 = jax.random.split(key, 4)
    gamma = 1.0 + 0.1 * jax.random.normal(k1, (c,), F32)
    beta = 0.1 * jax.random.normal(k2, (c,), F32)
    mean = 0.1 * jax.random.normal(k3, (c,), F32)
    var = 1.0 + 0.1 * jax.random.uniform(k4, (c,), F32)
    scale = gamma / jnp.sqrt(var + 1e-5)
    bias = beta - mean * scale
    return scale, bias


def init_enc_params(key, in_channels, out_channels=(12, 12, 48), repeats=4):
    params = []
    cin = in_channels
    oc0, oc1, oc2 = out_channels
    for _ in range(repeats):
        key, *ks = jax.random.split(key, 12)
        p = {}
        p["w_main"] = jax.random.normal(ks[0], (9, cin, oc2), F32) / jnp.sqrt(9.0 * cin)
        p["s_main"], p["b_main"] = _make_bn(ks[1], oc2)
        p["dw1"] = jax.random.normal(ks[2], (9, cin), F32) / 3.0
        p["pw1"] = jax.random.normal(ks[3], (cin, oc0), F32) / jnp.sqrt(float(cin))
        p["s1"], p["b1"] = _make_bn(ks[4], oc0)
        p["dw2"] = jax.random.normal(ks[5], (9, oc0), F32) / 3.0
        p["pw2"] = jax.random.normal(ks[6], (oc0, oc1), F32) / jnp.sqrt(float(oc0))
        p["s2"], p["b2"] = _make_bn(ks[7], oc1)
        p["dw3"] = jax.random.normal(ks[8], (9, oc1), F32) / 3.0
        p["pw3"] = jax.random.normal(ks[9], (oc1, oc2), F32) / jnp.sqrt(float(oc1))
        p["s3"], p["b3"] = _make_bn(ks[10], oc2)
        params.append(p)
        cin = oc2
    return params


if __name__ == "__main__":
    key = jax.random.PRNGKey(0)
    kx, kp = jax.random.split(key)

    # PyTorch-style NCHW input (batch=2, in_channels=4, spatial=16x16)
    x_nchw = jax.random.normal(kx, (2, 4, 16, 16), F32)
    params = init_enc_params(kp, in_channels=4)

    _roll_is_np_convention()                      # resolve roll direction once

    out = jax.jit(enc_forward)(x_nchw, params)
    out = jax.block_until_ready(out)
    assert out.shape == (2, 48, 8, 8)             # NCHW, matches the PyTorch module

    # correctness check against the pure-JAX reference (bf16 MXU operands ->
    # loose elementwise tolerance plus a tight global relative-L2 check)
    x_nhwc = jnp.transpose(x_nchw, (0, 2, 3, 1))
    ref = jnp.transpose(enc_forward_ref(x_nhwc, params), (0, 3, 1, 2))
    out_np, ref_np = np.asarray(out), np.asarray(ref)
    np.testing.assert_allclose(out_np, ref_np, rtol=5e-2, atol=5e-2)
    rel_l2 = np.linalg.norm(out_np - ref_np) / np.linalg.norm(ref_np)
    assert rel_l2 < 3e-2, f"relative L2 error too large: {rel_l2}"

    print("KERNEL_OK")
</pallas_src>

<mosaic_0001>
module attributes {stable_mosaic.version = 11 : i64} {
  func.func @k(%arg0: memref<8x128xf32, #tpu.memory_space<vmem>>, %arg1: memref<8x128xf32, #tpu.memory_space<vmem>>) attributes {dimension_semantics = [], scalar_prefetch = 0 : i64, scratch_operands = 0 : i64, tpu.core_type = #tpu.core_type<tc>} {
    %c0 = arith.constant 0 : index
    %c0_0 = arith.constant 0 : index
    %0 = vector.load %arg0[%c0, %c0_0] : memref<8x128xf32, #tpu.memory_space<vmem>>, vector<8x128xf32>
    %c1_i32 = arith.constant 1 : i32
    %1 = tpu.dynamic_rotate %0 by %c1_i32 dim 1 : vector<8x128xf32>, i32 -> vector<8x128xf32>
    %c0_1 = arith.constant 0 : index
    %c0_2 = arith.constant 0 : index
    %2 = vector.load %arg1[%c0_1, %c0_2] : memref<8x128xf32, #tpu.memory_space<vmem>>, vector<8x128xf32>
    tpu.vector_store %arg1[%c0_1, %c0_2], %1 {strides = array<i32>} : memref<8x128xf32, #tpu.memory_space<vmem>>, vector<8x128xf32>,
    return
  }
}

</mosaic_0001>

<bundles_post_ra>
// kernel: tpu_custom_call.1
= control target key start
LH: loop header
LB: loop body
LE: loop exit
PB: predicated region body
PF: predicated region fallthrough
CT: control target
= control target key end

     0   :  { %6 = vsyncpa [#allocation3], 0  ;;  %s128_s0 = inlined_call_operand.hbm [shape: f32[8,128], index: 0, kind: input, shape index: {}]   ;;  %s129_s1 = inlined_call_operand.hbm [shape: f32[8,128], index: 1, kind: output, shape index: {}]  }
   0x1   :  { %7 = vsyncpa [#allocation4], 0  ;;  %s91_s6 = smov [#allocation2]   ;;  %s43_s10 = scalar_lea.hbm %s128_s0, 128 }
   0x2   :  { %s14_s7 = sshll.u32 %s91_s6, 4  ;;  %p44_p0 = scmp.ne.s32.totalorder %s128_s0, %s43_s10  ;;  %s15_s7 = int_to_ptr.vmem [resolvable:$true] %s14_s7 }
   0x3   :  { %p47_p1 = scmp.lt.u32.totalorder %s43_s10, %s128_s0 }
   0x5   :  { %p49_p2 = pnand %p47_p1, %p44_p0 }
   0x7   :  { %52 = shalt.err (!%p49_p2)
}
   0x8   :  { %s53_s15 = scalar_lea.vmem %s15_s7, 128  ;;  %p58_p4 = scmp.lt.s32.totalorder %s15_s7, %s15_s7 }
   0x9   :  { %p54_p3 = scmp.ne.s32.totalorder %s15_s7, %s53_s15  ;;  %p59_p5 = scmp.lt.s32.totalorder %s53_s15, %s53_s15 }
   0xb   :  { %p60_p6 = por %p59_p5, %p58_p4 }
   0xd   :  { %p61_p7 = pnand %p60_p6, %p54_p3 }
   0xf   :  { %64 = shalt.err (!%p61_p7)
}
  0x10   :  { %17 = dma.hbm_to_vmem [thread:$0]  %s128_s0, 128, %s15_s7, [#allocation3]  }
  0x11   :  { %87 = dma.done.wait [#allocation3], 128  }
  0x12   :  { %88 = vsyncadd [#allocation3], 4294967168  ;;  %v21_v0 = vld [vmem:[#allocation2] sm:$0xff]  ;;  %s92_s18 = smov 1   ;;  %s93_s19 = smov [#allocation5]  }
  0x13   :  { %22 = vrot.lane.b32.xlu0 %v21_v0, %s92_s18  ;;  %s31_s20 = sshll.u32 %s93_s19, 4  ;;  %s32_s20 = int_to_ptr.vmem [resolvable:$true] %s31_s20 }
  0x14   :  { %s65_s21 = scalar_lea.vmem %s32_s20, 128  ;;  %p70_p9 = scmp.lt.s32.totalorder %s32_s20, %s32_s20 }
  0x15   :  { %p66_p8 = scmp.ne.s32.totalorder %s32_s20, %s65_s21  ;;  %p71_p10 = scmp.lt.s32.totalorder %s65_s21, %s65_s21 }
  0x17   :  { %p72_p11 = por %p71_p10, %p70_p9 }
  0x19   :  { %p73_p12 = pnand %p72_p11, %p66_p8 }
  0x85   :  { %v23_v1 = vpop.permute.xlu0 %22 }
  0x86   :  { %24 = vst [vmem:[#allocation5] sm:$0xff] %v23_v1 }
  0x87   :  { %76 = shalt.err (!%p73_p12)
}
  0x88   :  { %s77_s0 = scalar_lea.hbm %s129_s1, 128 }
  0x89   :  { %p78_p13 = scmp.ne.s32.totalorder %s129_s1, %s77_s0  ;;  %p81_p0 = scmp.lt.u32.totalorder %s77_s0, %s129_s1 }
  0x8b   :  { %p83_p1 = pnand %p81_p0, %p78_p13 }
  0x8d   :  { %86 = shalt.err (!%p83_p1)
}
  0x8e   :  { %34 = dma.vmem_to_hbm [thread:$0]  %s32_s20, 128, %s129_s1, [#allocation4]  }
  0x8f   :  { %89 = dma.done.wait [#allocation4], 128  }
  0x90   :  { %90 = vsyncadd [#allocation4], 4294967168 }
  0x91   :  { %38 = vsyncpa [#allocation3], 1 }
  0x92   :  { %39 = vsyncpa [#allocation4], 1 }

</bundles_post_ra>
